<compile_context>
chip_gen: v5e
topology: v5e:2x2
jax: 0.10.0
libtpu: 0.0.40
codegen_flags: <defaults>
</compile_context>

<pallas_src>
import functools

import jax
import jax.numpy as jnp
import numpy as np
from jax.experimental import pallas as pl
from jax.experimental.pallas import tpu as pltpu


# ----------------------------- Pallas kernel ---------------------------------

def _primary_caps_kernel(w_ref, b_ref, p_ref, o_ref, *, num_caps, cout):
    """Fused conv-matmul + bias + capsule squash.

    w_ref: (N, Kp)  bf16 stacked conv weights, row = capsule*Cout + out_channel
    b_ref: (N, 1)   f32 stacked biases (broadcast over lanes)
    p_ref: (Kp, tm) bf16 im2col patches, column = b*OH*OW + spatial (lane-dense)
    o_ref: (N, tm)  f32 squashed output: o[k*Cout+c, b*S+s] = v[b, c*S+s, k]
    """
    y = jnp.dot(w_ref[...], p_ref[...], preferred_element_type=jnp.float32)
    y = y + b_ref[...]                                   # (N, tm), f32
    tm = y.shape[-1]
    y3 = y.reshape(num_caps, cout, tm)                   # sublane-tile split (free)
    sq = jnp.sum(y3 * y3, axis=0, keepdims=True)         # (1, Cout, tm): cheap VPU adds
    # squash: |u|/(1+|u|^2) = sq*rsqrt(sq)*recip(1+sq); rsqrt + reciprocal both on EUP.
    factor = sq * jax.lax.rsqrt(sq + 1e-12) * pl.reciprocal(1.0 + sq, approx=True)
    o_ref[...] = (y3 * factor).reshape(num_caps * cout, tm)


# ------------------------------- JAX wrapper ----------------------------------

@functools.partial(jax.jit, static_argnames=("ksize", "stride"))
def primary_caps_forward(x, weights, biases, *, ksize=9, stride=2):
    """PrimaryCaps.forward.

    x:       (B, Cin, H, W)                          NCHW, float32
    weights: (num_caps, Cout, Cin, ksize, ksize)     PyTorch Conv2d layout, stacked
    biases:  (num_caps, Cout)
    returns: (B, Cout*OH*OW, num_caps)               squashed capsule vectors (f32)
    """
    B, cin, H, W = x.shape
    num_caps, cout = biases.shape
    OH = (H - ksize) // stride + 1
    OW = (W - ksize) // stride + 1
    S = OH * OW
    M = B * S
    K = cin * ksize * ksize
    N = num_caps * cout
    K_pad = -(-K // 16) * 16          # bf16 sublane pack = 16 rows per tile

    # im2col as one fused XLA op, emitted channel-major-first ("CNHW") so it
    # reshapes straight to (K, M) with NO transpose pass in HBM, and in bf16 so
    # the written/streamed patch bytes are halved.  Feature dim ordering is
    # channel-major (c*ksize*ksize + kh*ksize + kw), matching weights.reshape(N, K).
    x_bf = x.astype(jnp.bfloat16)
    patches = jax.lax.conv_general_dilated_patches(
        x_bf, filter_shape=(ksize, ksize), window_strides=(stride, stride),
        padding="VALID", dimension_numbers=("NCHW", "OIHW", "CNHW"))  # (K, B, OH, OW)
    patches_t = patches.reshape(K, M)                                 # column = b*S + s

    # --- M (lane) tile selection --------------------------------------------
    # Streamed, double-buffered bytes per step: patch tile (bf16) + output tile
    # (f32).  Weights/bias are grid-invariant but still double-buffered by the
    # default pipeliner, so they count against the budget too.
    resident = 2 * (N * K_pad * 2 + N * 4)
    budget = (28 << 20) - resident

    def _stream_bytes(t):
        return 2 * (K_pad * t * 2 + N * t * 4)

    tm = 128
    while tm < 2048 and tm < M and _stream_bytes(2 * tm) <= budget:
        tm *= 2
    # v7x: keep >=2 grid steps (one per TensorCore) whenever M allows it.
    while tm > 128 and (M + tm - 1) // tm < 2:
        tm //= 2
    M_pad = -(-M // tm) * tm

    pad_k, pad_m = K_pad - K, M_pad - M
    if pad_k or pad_m:
        patches_t = jnp.pad(patches_t, ((0, pad_k), (0, pad_m)))

    w_mat = weights.reshape(N, K)
    if pad_k:
        w_mat = jnp.pad(w_mat, ((0, 0), (0, pad_k)))
    w_mat = w_mat.astype(jnp.bfloat16)                   # row = k*Cout + c
    b_mat = biases.reshape(N, 1).astype(jnp.float32)

    # Explicit scoped-VMEM limit: covers all double-buffered tiles + margin,
    # >= the 16 MiB v5e default, <= v7x's 64 MiB physical VMEM per TC.
    vmem_limit = int(min(max(resident + _stream_bytes(tm) + (8 << 20), 32 << 20),
                         56 << 20))

    kernel = functools.partial(_primary_caps_kernel, num_caps=num_caps, cout=cout)
    out = pl.pallas_call(
        kernel,
        out_shape=jax.ShapeDtypeStruct((N, M_pad), jnp.float32),
        grid=(M_pad // tm,),
        in_specs=[
            pl.BlockSpec((N, K_pad), lambda i: (0, 0)),   # weights: VMEM-resident
            pl.BlockSpec((N, 1), lambda i: (0, 0)),       # bias:    VMEM-resident
            pl.BlockSpec((K_pad, tm), lambda i: (0, i)),  # patch tile (streamed)
        ],
        out_specs=pl.BlockSpec((N, tm), lambda i: (0, i)),
        compiler_params=pltpu.CompilerParams(
            dimension_semantics=("parallel",),            # shard M tiles over TCs
            vmem_limit_bytes=vmem_limit),
    )(w_mat, b_mat, patches_t)
    # TODO(synk): pipeline_mode=pl.Buffered(1) on the grid-invariant weight/bias
    # specs and a bf16 o_ref would shave a little more VMEM / writeback if the
    # downstream routing layer tolerates bf16.

    # out[k*Cout+c, b*S+s] == squash(u)[b, c*S+s, k]; emit the module's layout.
    u = out[:, :M].reshape(num_caps, cout, B, S)
    return jnp.transpose(u, (2, 1, 3, 0)).reshape(B, cout * S, num_caps)


# ------------------------------ pure-JAX reference ----------------------------

def primary_caps_reference(x, weights, biases, *, stride=2):
    B = x.shape[0]
    num_caps = weights.shape[0]
    us = []
    for k in range(num_caps):
        y = jax.lax.conv_general_dilated(
            x, weights[k], window_strides=(stride, stride), padding="VALID",
            dimension_numbers=("NCHW", "OIHW", "NCHW"),
            precision=jax.lax.Precision.HIGHEST)
        y = y + biases[k][None, :, None, None]
        us.append(y.reshape(B, -1, 1))
    u = jnp.concatenate(us, axis=-1)
    sq = jnp.sum(u * u, axis=-1, keepdims=True)
    return (sq / (1.0 + sq)) * u / jnp.sqrt(sq)


# ----------------------------------- main --------------------------------------

if __name__ == "__main__":
    # Small shapes consistent with the module: Conv2d(k=9, stride=2, pad=0),
    # input spatial 15 -> output spatial 4.
    B, CIN, H, W = 2, 8, 15, 15
    NUM_CAPS, COUT, KSIZE, STRIDE = 6, 8, 9, 2

    key = jax.random.PRNGKey(0)
    kx, kw, kb = jax.random.split(key, 3)
    x = jax.random.normal(kx, (B, CIN, H, W), dtype=jnp.float32)
    # Deterministic parameter init (synthetic; ~ PyTorch kaiming-uniform scale).
    fan_in = CIN * KSIZE * KSIZE
    bound = 1.0 / np.sqrt(fan_in)
    weights = jax.random.uniform(kw, (NUM_CAPS, COUT, CIN, KSIZE, KSIZE),
                                 dtype=jnp.float32, minval=-bound, maxval=bound)
    biases = jax.random.uniform(kb, (NUM_CAPS, COUT), dtype=jnp.float32,
                                minval=-bound, maxval=bound)

    out = primary_caps_forward(x, weights, biases, ksize=KSIZE, stride=STRIDE)
    out = jax.block_until_ready(out)

    ref = primary_caps_reference(x, weights, biases, stride=STRIDE)
    # bf16 inputs with f32 accumulation -> looser tolerance than the f32 path.
    np.testing.assert_allclose(np.asarray(out), np.asarray(ref), rtol=2e-2, atol=2e-2)
    assert out.shape == (B, COUT * 4 * 4, NUM_CAPS)

    print("KERNEL_OK")
</pallas_src>

<mosaic_0001>
module attributes {stable_mosaic.version = 11 : i64} {
  func.func @_primary_caps_kernel(%arg0: i32, %arg1: memref<48x656xbf16, #tpu.memory_space<vmem>>, %arg2: memref<48x1xf32, #tpu.memory_space<vmem>>, %arg3: memref<656x128xbf16, #tpu.memory_space<vmem>>, %arg4: memref<48x128xf32, #tpu.memory_space<vmem>>) attributes {dimension_semantics = [#tpu.dimension_semantics<parallel>], iteration_bounds = array<i64: 1>, scalar_prefetch = 0 : i64, scratch_operands = 0 : i64, tpu.core_type = #tpu.core_type<tc>, window_params = [{pipeline_mode = #tpu.pipeline_mode<synchronous>, transform_indices = @transform_0, window_bounds = array<i64: 48, 656>}, {pipeline_mode = #tpu.pipeline_mode<synchronous>, transform_indices = @transform_1, window_bounds = array<i64: 48, 1>}, {transform_indices = @transform_2, window_bounds = array<i64: 656, 128>}, {transform_indices = @transform_3, window_bounds = array<i64: 48, 128>}]} {
    %c0 = arith.constant 0 : index
    %c0_0 = arith.constant 0 : index
    %0 = vector.load %arg1[%c0, %c0_0] : memref<48x656xbf16, #tpu.memory_space<vmem>>, vector<48x656xbf16>
    %c0_1 = arith.constant 0 : index
    %c0_2 = arith.constant 0 : index
    %1 = vector.load %arg3[%c0_1, %c0_2] : memref<656x128xbf16, #tpu.memory_space<vmem>>, vector<656x128xbf16>
    %cst = arith.constant dense<0.000000e+00> : vector<48x128xf32>
    %2 = tpu.matmul %0, %1, %cst {dimension_numbers = #tpu.dot_dimension_numbers<[1], [0], [0], [1], [0, 0, 1, 1], [], []>} : vector<48x656xbf16>, vector<656x128xbf16>, vector<48x128xf32> -> vector<48x128xf32>
    %c0_3 = arith.constant 0 : index
    %c0_4 = arith.constant 0 : index
    %3 = vector.load %arg2[%c0_3, %c0_4] : memref<48x1xf32, #tpu.memory_space<vmem>>, vector<48x1xf32>
    %4 = vector.broadcast %3 : vector<48x1xf32> to vector<48x128xf32>
    %5 = arith.addf %2, %4 : vector<48x128xf32>
    %6 = vector.shape_cast %5 : vector<48x128xf32> to vector<6x8x128xf32>
    %7 = arith.mulf %6, %6 : vector<6x8x128xf32>
    %cst_5 = arith.constant dense<0.000000e+00> : vector<8x128xf32>
    %8 = vector.multi_reduction <add>, %7, %cst_5 [0] : vector<6x8x128xf32> to vector<8x128xf32>
    %9 = vector.shape_cast %8 : vector<8x128xf32> to vector<1x8x128xf32>
    %cst_6 = arith.constant 9.99999996E-13 : f32
    %10 = vector.broadcast %cst_6 : f32 to vector<1x8x128xf32>
    %11 = arith.addf %9, %10 : vector<1x8x128xf32>
    %12 = math.rsqrt %11 : vector<1x8x128xf32>
    %13 = arith.mulf %9, %12 : vector<1x8x128xf32>
    %cst_7 = arith.constant 1.000000e+00 : f32
    %14 = vector.broadcast %cst_7 : f32 to vector<1x8x128xf32>
    %15 = arith.addf %14, %9 : vector<1x8x128xf32>
    %16 = tpu.reciprocal %15 {approx = true} : vector<1x8x128xf32> -> vector<1x8x128xf32>
    %17 = arith.mulf %13, %16 : vector<1x8x128xf32>
    %18 = vector.broadcast %17 : vector<1x8x128xf32> to vector<6x8x128xf32>
    %19 = arith.mulf %6, %18 : vector<6x8x128xf32>
    %20 = vector.shape_cast %19 : vector<6x8x128xf32> to vector<48x128xf32>
    %c0_8 = arith.constant 0 : index
    %c0_9 = arith.constant 0 : index
    %21 = vector.load %arg4[%c0_8, %c0_9] : memref<48x128xf32, #tpu.memory_space<vmem>>, vector<48x128xf32>
    tpu.vector_store %arg4[%c0_8, %c0_9], %20 {strides = array<i32>} : memref<48x128xf32, #tpu.memory_space<vmem>>, vector<48x128xf32>,
    return
  }
  func.func @transform_0(%arg0: i32) -> (i32, i32) {
    %c0_i32 = arith.constant 0 : i32
    %c0_i32_0 = arith.constant 0 : i32
    %c0_i32_1 = arith.constant 0 : i32
    return %c0_i32, %c0_i32_0 : i32, i32
  }
  func.func @transform_1(%arg0: i32) -> (i32, i32) {
    %c0_i32 = arith.constant 0 : i32
    %c0_i32_0 = arith.constant 0 : i32
    %c0_i32_1 = arith.constant 0 : i32
    return %c0_i32, %c0_i32_0 : i32, i32
  }
  func.func @transform_2(%arg0: i32) -> (i32, i32) {
    %c0_i32 = arith.constant 0 : i32
    %c0_i32_0 = arith.constant 0 : i32
    return %c0_i32, %arg0 : i32, i32
  }
  func.func @transform_3(%arg0: i32) -> (i32, i32) {
    %c0_i32 = arith.constant 0 : i32
    %c0_i32_0 = arith.constant 0 : i32
    return %c0_i32, %arg0 : i32, i32
  }
}

</mosaic_0001>

<bundles_post_ra>
// kernel: primary_caps_forward.1
= control target key start
LH: loop header
LB: loop body
LE: loop exit
PB: predicated region body
PF: predicated region fallthrough
CT: control target
= control target key end

     0   :  { %v1002_v9 = vmov 0   ;;  %vm484_vm0 = vcmask 130048   ;;  %s1293_s2 = inlined_call_operand.vmem [shape: bf16[656,128], index: 2, kind: input, shape index: {}]   ;;  %s1294_s1 = inlined_call_operand.vmem [shape: f32[48,1], index: 1, kind: input, shape index: {}]   ;;  %s1295_s0 = inlined_call_operand.vmem [shape: bf16[48,656], index: 0, kind: input, shape index: {}]   ;;  %s1296_s3 = inlined_call_operand.vmem [shape: f32[48,128], index: 3, kind: output, shape index: {}]  }
   0x1   :  { %v944_v0 = vld [vmem:[%s1293_s2 + $0x38] sm:$0xff]  ;;  %v943_v2 = vld [vmem:[%s1293_s2 + $0x30] sm:$0xff]  ;;  %v942_v4 = vld [vmem:[%s1293_s2 + $0x28] sm:$0xff]  ;;  %995 = vset.pattern.permute.xlu0 %v1002_v9  ;;  %996 = vset.pattern.permute.xlu1 %v1002_v9 }
   0x2   :  { %v952_v1 = vld [vmem:[%s1293_s2 + $0x78] sm:$0xff]  ;;  %494 = vmatpush.bf16.msra.mxu0 %v944_v0  ;;  %978 = vmatpush.bf16.msra.mxu2 %v944_v0  ;;  %v951_v3 = vld [vmem:[%s1293_s2 + $0x70] sm:$0xff]  ;;  %v950_v5 = vld [vmem:[%s1293_s2 + $0x68] sm:$0xff] }
   0x3   :  { %986 = vmatpush.bf16.msra.mxu3 %v952_v1  ;;  %518 = vmatpush.bf16.msra.mxu1 %v952_v1  ;;  %v941_v6 = vld [vmem:[%s1293_s2 + $0x20] sm:$0xff]  ;;  %v940_v10 = vld [vmem:[%s1293_s2 + $0x18] sm:$0xff]  ;;  %v939_v12 = vld [vmem:[%s1293_s2 + $0x10] sm:$0xff] }
   0x4   :  { %v949_v7 = vld [vmem:[%s1293_s2 + $0x60] sm:$0xff]  ;;  %997 = vset.pattern.permute.xlu2 %v1002_v9  ;;  %v948_v11 = vld [vmem:[%s1293_s2 + $0x58] sm:$0xff]  ;;  %v947_v13 = vld [vmem:[%s1293_s2 + $0x50] sm:$0xff] }
   0x5   :  { %v115_v8 = vld [vmem:[%s1294_s1] sm:$0xff]  ;;  %v116_v14 = vld [vmem:[%s1294_s1 + $0x8] sm:$0xff]  ;;  %v960_v19 = vld [vmem:[%s1293_s2 + $0xb8] sm:$0xff] }
   0x6   :  { %495 = vmatpush.bf16.msra.mxu0 %v943_v2  ;;  %979 = vmatpush.bf16.msra.mxu2 %v943_v2  ;;  %v938_v15 = vld [vmem:[%s1293_s2 + $0x8] sm:$0xff]  ;;  %v937_v17 = vld [vmem:[%s1293_s2] sm:$0xff]  ;;  %v922_v21 = vld [vmem:[%s1295_s0 + $0x14] sm:$0xf0] }
   0x7   :  { %987 = vmatpush.bf16.msra.mxu3 %v951_v3  ;;  %519 = vmatpush.bf16.msra.mxu1 %v951_v3  ;;  %v946_v16 = vld [vmem:[%s1293_s2 + $0x48] sm:$0xff]  ;;  %v945_v18 = vld [vmem:[%s1293_s2 + $0x40] sm:$0xff]  ;;  %v934_v23 = vld [vmem:[%s1295_s0 + $0x74] sm:$0xf0] }
   0x8   :  { %123 = vperm.xlu0 %995, %v115_v8   ;;  %v682_v20 = vld [vmem:[%s1295_s0] sm:$0xf]  ;;  %v925_v24 = vld [vmem:[%s1295_s0 + $0x34] sm:$0xf]  ;;  %v708_v25 = vld [vmem:[%s1295_s0 + $0x48] sm:$0xf0] }
   0x9   :  { %v730_v22 = vld [vmem:[%s1295_s0 + $0x60] sm:$0xf]  ;;  %v117_v26 = vld [vmem:[%s1294_s1 + $0x10] sm:$0xff]  ;;  %v968_v27 = vld [vmem:[%s1293_s2 + $0xf8] sm:$0xff]  ;;  %v683_v30 = vor.u32 %v922_v21, %v682_v20  ;;  %v711_v32 = vor.u32 %v925_v24, %v708_v25 }
   0xa   :  { %496 = vmatpush.bf16.msra.mxu0 %v942_v4  ;;  %980 = vmatpush.bf16.msra.mxu2 %v942_v4  ;;  %v919_v28 = vld [vmem:[%s1295_s0 + $0x4] sm:$0xf]  ;;  %v684_v29 = vld [vmem:[%s1295_s0 + $0x18] sm:$0xf0]  ;;  %v731_v31 = vor.u32 %v934_v23, %v730_v22  ;;  %v959_v35 = vld [vmem:[%s1293_s2 + $0xb0] sm:$0xff] }
   0xb   :  { %988 = vmatpush.bf16.msra.mxu3 %v950_v5  ;;  %520 = vmatpush.bf16.msra.mxu1 %v950_v5  ;;  %v976_v33 = vld [vmem:[%s1293_s2 + $0x138] sm:$0xff]  ;;  %v687_v34 = vor.u32 %v919_v28, %v684_v29  ;;  %v967_v36 = vld [vmem:[%s1293_s2 + $0xf0] sm:$0xff]  ;;  %v977_v37 = vld [vmem:[%s1293_s2 + $0x140] sm:$0xff] }
   0xc   :  { %133 = vperm.xlu1 %996, %v117_v26   ;;  %v975_v38 = vld [vmem:[%s1293_s2 + $0x130] sm:$0xff]  ;;  %v118_v39 = vld [vmem:[%s1294_s1 + $0x18] sm:$0xff]  ;;  %v958_v40 = vld [vmem:[%s1293_s2 + $0xa8] sm:$0xff] }
   0xd   :  { %v966_v41 = vld [vmem:[%s1293_s2 + $0xe8] sm:$0xff]  ;;  %v957_v43 = vld [vmem:[%s1293_s2 + $0xa0] sm:$0xff]  ;;  %v706_v46 = vld [vmem:[%s1295_s0 + $0x30] sm:$0xf] }
   0xe   :  { %497 = vmatpush.bf16.msra.mxu0 %v941_v6  ;;  %981 = vmatpush.bf16.msra.mxu2 %v941_v6  ;;  %v974_v42 = vld [vmem:[%s1293_s2 + $0x128] sm:$0xff]  ;;  %v965_v44 = vld [vmem:[%s1293_s2 + $0xe0] sm:$0xff]  ;;  %v956_v48 = vld [vmem:[%s1293_s2 + $0x98] sm:$0xff] }
   0xf   :  { %989 = vmatpush.bf16.msra.mxu3 %v949_v7  ;;  %521 = vmatpush.bf16.msra.mxu1 %v949_v7  ;;  %v973_v45 = vld [vmem:[%s1293_s2 + $0x120] sm:$0xff]  ;;  %v928_v47 = vld [vmem:[%s1295_s0 + $0x44] sm:$0xf0]  ;;  %v732_v50 = vld [vmem:[%s1295_s0 + $0x78] sm:$0xf0] }
  0x10   :  { %128 = vperm.xlu0 %995, %v116_v14   ;;  %v931_v49 = vld [vmem:[%s1295_s0 + $0x64] sm:$0xf]  ;;  %v964_v51 = vld [vmem:[%s1293_s2 + $0xd8] sm:$0xff]  ;;  %v921_v52 = vld [vmem:[%s1295_s0 + $0x14] sm:$0xf]  ;;  %v707_v54 = vor.u32 %v928_v47, %v706_v46 }
  0x11   :  { %v700_v53 = vld [vmem:[%s1295_s0 + $0x28] sm:$0xf0]  ;;  %v735_v55 = vor.u32 %v931_v49, %v732_v50  ;;  %v972_v56 = vld [vmem:[%s1293_s2 + $0x118] sm:$0xff]  ;;  %v119_v57 = vld [vmem:[%s1294_s1 + $0x20] sm:$0xff] }
  0x12   :  { %498 = vmatpush.bf16.msra.mxu0 %v940_v10  ;;  %982 = vmatpush.bf16.msra.mxu2 %v940_v10  ;;  %v955_v58 = vld [vmem:[%s1293_s2 + $0x90] sm:$0xff]  ;;  %v703_v59 = vor.u32 %v921_v52, %v700_v53  ;;  %v954_v62 = vld [vmem:[%s1293_s2 + $0x88] sm:$0xff]  ;;  %v953_v2 = vld [vmem:[%s1293_s2 + $0x80] sm:$0xff] }
  0x13   :  { %990 = vmatpush.bf16.msra.mxu3 %v948_v11  ;;  %522 = vmatpush.bf16.msra.mxu1 %v948_v11  ;;  %v963_v60 = vld [vmem:[%s1293_s2 + $0xd0] sm:$0xff]  ;;  %v962_v63 = vld [vmem:[%s1293_s2 + $0xc8] sm:$0xff]  ;;  %v923_v4 = vld [vmem:[%s1295_s0 + $0x1c] sm:$0xf0] }
  0x14   :  { %138 = vperm.xlu1 %996, %v118_v39   ;;  %143 = vperm.xlu2 %997, %v119_v57   ;;  %v971_v61 = vld [vmem:[%s1293_s2 + $0x110] sm:$0xff]  ;;  %v120_v0 = vld [vmem:[%s1294_s1 + $0x28] sm:$0xff]  ;;  %v961_v5 = vld [vmem:[%s1293_s2 + $0xc0] sm:$0xff] }
  0x15   :  { %v970_v1 = vld [vmem:[%s1293_s2 + $0x108] sm:$0xff]  ;;  %v969_v7 = vld [vmem:[%s1293_s2 + $0x100] sm:$0xff]  ;;  %v698_v8 = vld [vmem:[%s1295_s0 + $0x10] sm:$0xf] }
  0x16   :  { %499 = vmatpush.bf16.msra.mxu0 %v939_v12  ;;  %983 = vmatpush.bf16.msra.mxu2 %v939_v12  ;;  %v690_v3 = vld [vmem:[%s1295_s0 + $0x8] sm:$0xf]  ;;  %v920_v10 = vld [vmem:[%s1295_s0 + $0xc] sm:$0xf]  ;;  %v692_v11 = vld [vmem:[%s1295_s0 + $0x20] sm:$0xf0] }
  0x17   :  { %991 = vmatpush.bf16.msra.mxu3 %v947_v13  ;;  %523 = vmatpush.bf16.msra.mxu1 %v947_v13  ;;  %v691_v6 = vor.u32 %v923_v4, %v690_v3  ;;  %v924_v9 = vld [vmem:[%s1295_s0 + $0x24] sm:$0xf0]  ;;  %v927_v12 = vld [vmem:[%s1295_s0 + $0x44] sm:$0xf]  ;;  %v724_v13 = vld [vmem:[%s1295_s0 + $0x58] sm:$0xf0] }
  0x18   :  { %v699_v14 = vor.u32 %v924_v9, %v698_v8  ;;  %v722_v20 = vld [vmem:[%s1295_s0 + $0x40] sm:$0xf]  ;;  %v930_v21 = vld [vmem:[%s1295_s0 + $0x54] sm:$0xf0]  ;;  %v926_v22 = vld [vmem:[%s1295_s0 + $0x3c] sm:$0xf] }
  0x19   :  { %v716_v23 = vld [vmem:[%s1295_s0 + $0x50] sm:$0xf0]  ;;  %v748_v25 = vld [vmem:[%s1295_s0 + $0x88] sm:$0xf0]  ;;  %v723_v26 = vor.u32 %v930_v21, %v722_v20  ;;  %v738_v29 = vld [vmem:[%s1295_s0 + $0x68] sm:$0xf] }
  0x1a   :  { %500 = vmatpush.bf16.msra.mxu0 %v938_v15  ;;  %984 = vmatpush.bf16.msra.mxu2 %v938_v15  ;;  %v695_v15 = vor.u32 %v920_v10, %v692_v11  ;;  %v933_v24 = vld [vmem:[%s1295_s0 + $0x74] sm:$0xf] }
  0x1b   :  { %992 = vmatpush.bf16.msra.mxu3 %v946_v16  ;;  %524 = vmatpush.bf16.msra.mxu1 %v946_v16  ;;  %v727_v16 = vor.u32 %v927_v12, %v724_v13  ;;  %v751_v28 = vor.u32 %v933_v24, %v748_v25 }
  0x1c   :  { %148 = vperm.xlu2 %997, %v120_v0  }
  0x1e   :  { %501 = vmatpush.bf16.msra.mxu0 %v937_v17  ;;  %985 = vmatpush.bf16.msra.mxu2 %v937_v17  ;;  %v714_v17 = vld [vmem:[%s1295_s0 + $0x38] sm:$0xf] }
  0x1f   :  { %993 = vmatpush.bf16.msra.mxu3 %v945_v18  ;;  %525 = vmatpush.bf16.msra.mxu1 %v945_v18  ;;  %v929_v18 = vld [vmem:[%s1295_s0 + $0x4c] sm:$0xf0] }
  0x21   :  { %502 = vmatmul.bf16.vlgmr.msra.gmra.mxu0 %v683_v30  ;;  %512 = vmatmul.bf16.vlgmr.msra.gmra.mxu2 %v731_v31  ;;  %v935_v30 = vld [vmem:[%s1295_s0 + $0x7c] sm:$0xf0] }
  0x22   :  { %542 = vmatpush.bf16.msrb.mxu2 %v960_v19  ;;  %531 = vmatmul.bf16.vlgmr.msra.gmra.mxu3 %v711_v32  ;;  %v715_v19 = vor.u32 %v929_v18, %v714_v17  ;;  %v739_v31 = vor.u32 %v935_v30, %v738_v29  ;;  %v746_v32 = vld [vmem:[%s1295_s0 + $0x70] sm:$0xf] }
  0x23   :  { %566 = vmatpush.bf16.msrb.mxu3 %v968_v27  ;;  %590 = vmatpush.bf16.msrb.mxu0 %v976_v33  ;;  %v719_v27 = vor.u32 %v926_v22, %v716_v23  ;;  %v936_v33 = vld [vmem:[%s1295_s0 + $0x84] sm:$0xf0] }
  0x24   :  { %526 = vmatmul.bf16.vlgmr.msra.gmra.mxu1 %v687_v34  ;;  %v932_v34 = vld [vmem:[%s1295_s0 + $0x6c] sm:$0xf] }
  0x25   :  { %621 = vmatpush.bf16.msrb.mxu1 %v977_v37 }
  0x26   :  { %543 = vmatpush.bf16.msrb.mxu2 %v959_v35  ;;  %v740_v35 = vld [vmem:[%s1295_s0 + $0x80] sm:$0xf0] }
  0x27   :  { %567 = vmatpush.bf16.msrb.mxu3 %v967_v36  ;;  %591 = vmatpush.bf16.msrb.mxu0 %v975_v38  ;;  %v747_v36 = vor.u32 %v936_v33, %v746_v32  ;;  %v743_v37 = vor.u32 %v932_v34, %v740_v35 }
  0x2a   :  { %544 = vmatpush.bf16.msrb.mxu2 %v958_v40 }
  0x2b   :  { %568 = vmatpush.bf16.msrb.mxu3 %v966_v41  ;;  %592 = vmatpush.bf16.msrb.mxu0 %v974_v42 }
  0x2e   :  { %545 = vmatpush.bf16.msrb.mxu2 %v957_v43 }
  0x2f   :  { %569 = vmatpush.bf16.msrb.mxu3 %v965_v44  ;;  %593 = vmatpush.bf16.msrb.mxu0 %v973_v45 }
  0x31   :  { %507 = vmatmul.bf16.gmra.mxu0 %v707_v54 }
  0x32   :  { %546 = vmatpush.bf16.msrb.mxu2 %v956_v48  ;;  %536 = vmatmul.bf16.gmra.mxu3 %v735_v55 }
  0x33   :  { %570 = vmatpush.bf16.msrb.mxu3 %v964_v51  ;;  %594 = vmatpush.bf16.msrb.mxu0 %v972_v56 }
  0x34   :  { %916 = vmatmul.msk.bf16.vlgmr.msrb.gmra.mxu1 %vm484_vm0, %v703_v59 }
  0x36   :  { %547 = vmatpush.bf16.msrb.mxu2 %v955_v58 }
  0x37   :  { %571 = vmatpush.bf16.msrb.mxu3 %v963_v60  ;;  %595 = vmatpush.bf16.msrb.mxu0 %v971_v61 }
  0x3a   :  { %548 = vmatpush.bf16.msrb.mxu2 %v954_v62 }
  0x3b   :  { %572 = vmatpush.bf16.msrb.mxu3 %v962_v63  ;;  %596 = vmatpush.bf16.msrb.mxu0 %v970_v1 }
  0x3e   :  { %549 = vmatpush.bf16.msrb.mxu2 %v953_v2 }
  0x3f   :  { %573 = vmatpush.bf16.msrb.mxu3 %v961_v5  ;;  %597 = vmatpush.bf16.msrb.mxu0 %v969_v7 }
  0x41   :  { %550 = vmatmul.bf16.vlgmr.msrb.gmra.mxu2 %v691_v6 }
  0x42   :  { %598 = vmatmul.bf16.vlgmr.msrb.gmra.mxu0 %v699_v14  ;;  %574 = vmatmul.bf16.vlgmr.msrb.gmra.mxu3 %v695_v15 }
  0x44   :  { %917 = vmatmul.msk.bf16.gmra.mxu1 %vm484_vm0, %v727_v16 }
  0x51   :  { %555 = vmatmul.bf16.gmra.mxu2 %v715_v19 }
  0x52   :  { %603 = vmatmul.bf16.gmra.mxu0 %v723_v26  ;;  %579 = vmatmul.bf16.gmra.mxu3 %v719_v27 }
  0x54   :  { %918 = vmatmul.msk.bf16.gmra.mxu1 %vm484_vm0, %v751_v28 }
  0x61   :  { %560 = vmatmul.bf16.gmra.mxu2 %v739_v31 }
  0x62   :  { %608 = vmatmul.bf16.gmra.mxu0 %v747_v36  ;;  %584 = vmatmul.bf16.gmra.mxu3 %v743_v37 }
  0x6e   :  { %v144_v7 = vpop.permute.xlu2 %143 }
  0x76   :  { %v149_v28 = vpop.permute.xlu2 %148 }
  0x7a   :  { %v124_v54 = vpop.permute.xlu0 %123 }
  0x7e   :  { %v134_v58 = vpop.permute.xlu1 %133 }
  0x82   :  { %v129_v60 = vpop.permute.xlu0 %128 }
  0x86   :  { %v139_v1 = vpop.permute.xlu1 %138 }
  0x9e   :  { %v503_v38 = vpop.f32.mrf.mxu0 }
  0x9f   :  { %v504_v3 = vadd.f32 %v503_v38, %v124_v54 }
  0xa1   :  { %v527_v41 = vpop.f32.mrf.mxu1 }
  0xa2   :  { %v528_v9 = vadd.f32 %v527_v41, %v504_v3 }
  0xa4   :  { %v513_v44 = vpop.f32.mrf.mxu2 }
  0xa5   :  { %v532_v39 = vpop.f32.mrf.mxu3  ;;  %v514_v13 = vadd.f32 %v513_v44, %v144_v7 }
  0xa6   :  { %v505_v40 = vpop.f32.mrf.mxu0 }
  0xa7   :  { %v506_v0 = vadd.f32 %v505_v40, %v129_v60 }
  0xa9   :  { %v529_v47 = vpop.f32.mrf.mxu1 }
  0xaa   :  { %v530_v5 = vadd.f32 %v529_v47, %v506_v0 }
  0xac   :  { %v515_v48 = vpop.f32.mrf.mxu2 }
  0xad   :  { %v534_v42 = vpop.f32.mrf.mxu3  ;;  %v516_v33 = vadd.f32 %v515_v48, %v149_v28 }
  0xae   :  { %v508_v43 = vpop.f32.mrf.mxu0 }
  0xaf   :  { %v509_v4 = vadd.f32 %v508_v43, %v134_v58 }
  0xb1   :  { %v623_v51 = vpop.f32.mrf.mxu1  ;;  %v533_v11 = vadd.f32 %v532_v39, %v509_v4 }
  0xb5   :  { %v537_v45 = vpop.f32.mrf.mxu3 }
  0xb6   :  { %v510_v46 = vpop.f32.mrf.mxu0  ;;  %v538_v21 = vadd.f32 %v537_v45, %v514_v13 }
  0xb7   :  { %v511_v6 = vadd.f32 %v510_v46, %v139_v1 }
  0xb9   :  { %v625_v56 = vpop.f32.mrf.mxu1  ;;  %v535_v16 = vadd.f32 %v534_v42, %v511_v6 }
  0xbd   :  { %v539_v49 = vpop.f32.mrf.mxu3 }
  0xbe   :  { %v540_v38 = vadd.f32 %v539_v49, %v516_v33 }
  0xbf   :  { %v599_v50 = vpop.f32.mrf.mxu0 }
  0xc1   :  { %v628_v63 = vpop.f32.mrf.mxu1 }
  0xc4   :  { %v551_v52 = vpop.f32.mrf.mxu2 }
  0xc5   :  { %v575_v53 = vpop.f32.mrf.mxu3  ;;  %v552_v14 = vadd.f32 %v551_v52, %v528_v9 }
  0xc7   :  { %v601_v55 = vpop.f32.mrf.mxu0  ;;  %v576_v22 = vadd.f32 %v575_v53, %v552_v14 }
  0xc9   :  { %v630_v17 = vpop.f32.mrf.mxu1  ;;  %v600_v29 = vadd.f32 %v599_v50, %v576_v22 }
  0xcb   :  { %v624_v39 = vadd.f32 %v623_v51, %v600_v29 }
  0xcc   :  { %v553_v57 = vpop.f32.mrf.mxu2 }
  0xcd   :  { %v577_v59 = vpop.f32.mrf.mxu3  ;;  %v554_v10 = vadd.f32 %v553_v57, %v530_v5  ;;  %v638_v46 = vmul.f32 %v624_v39, %v624_v39 }
  0xcf   :  { %v604_v61 = vpop.f32.mrf.mxu0  ;;  %v578_v19 = vadd.f32 %v577_v59, %v554_v10 }
  0xd1   :  { %v602_v25 = vadd.f32 %v601_v55, %v578_v19  ;;  %v633_v37 = vpop.f32.mrf.mxu1 }
  0xd3   :  { %v626_v34 = vadd.f32 %v625_v56, %v602_v25 }
  0xd4   :  { %v556_v62 = vpop.f32.mrf.mxu2 }
  0xd5   :  { %v580_v2 = vpop.f32.mrf.mxu3  ;;  %v557_v15 = vadd.f32 %v556_v62, %v533_v11  ;;  %v639_v43 = vmul.f32 %v626_v34, %v626_v34 }
  0xd7   :  { %v606_v12 = vpop.f32.mrf.mxu0  ;;  %v581_v23 = vadd.f32 %v580_v2, %v557_v15  ;;  %v644_v53 = vadd.f32 %v639_v43, %v638_v46 }
  0xd9   :  { %v605_v30 = vadd.f32 %v604_v61, %v581_v23  ;;  %v635_v59 = vpop.f32.mrf.mxu1 }
  0xdb   :  { %v629_v40 = vadd.f32 %v628_v63, %v605_v30 }
  0xdc   :  { %v558_v8 = vpop.f32.mrf.mxu2 }
  0xdd   :  { %v582_v18 = vpop.f32.mrf.mxu3  ;;  %v559_v20 = vadd.f32 %v558_v8, %v535_v16  ;;  %v640_v47 = vmul.f32 %v629_v40, %v629_v40 }
  0xdf   :  { %v583_v26 = vadd.f32 %v582_v18, %v559_v20  ;;  %v609_v31 = vpop.f32.mrf.mxu0  ;;  %v645_v56 = vadd.f32 %v644_v53, %v640_v47 }
  0xe1   :  { %v607_v35 = vadd.f32 %v606_v12, %v583_v26 }
  0xe3   :  { %v631_v44 = vadd.f32 %v630_v17, %v607_v35 }
  0xe4   :  { %v561_v24 = vpop.f32.mrf.mxu2 }
  0xe5   :  { %v562_v27 = vadd.f32 %v561_v24, %v538_v21  ;;  %v585_v32 = vpop.f32.mrf.mxu3  ;;  %v641_v54 = vmul.f32 %v631_v44, %v631_v44 }
  0xe7   :  { %v586_v36 = vadd.f32 %v585_v32, %v562_v27  ;;  %v611_v48 = vpop.f32.mrf.mxu0  ;;  %v646_v49 = vadd.f32 %v645_v56, %v641_v54 }
  0xe9   :  { %v610_v41 = vadd.f32 %v609_v31, %v586_v36 }
  0xeb   :  { %v634_v52 = vadd.f32 %v633_v37, %v610_v41 }
  0xec   :  { %v563_v42 = vpop.f32.mrf.mxu2 }
  0xed   :  { %v564_v45 = vadd.f32 %v563_v42, %v540_v38  ;;  %v587_v50 = vpop.f32.mrf.mxu3  ;;  %v642_v57 = vmul.f32 %v634_v52, %v634_v52 }
  0xef   :  { %v588_v55 = vadd.f32 %v587_v50, %v564_v45  ;;  %v647_v60 = vadd.f32 %v646_v49, %v642_v57 }
  0xf1   :  { %v612_v58 = vadd.f32 %v611_v48, %v588_v55 }
  0xf3   :  { %v636_v51 = vadd.f32 %v635_v59, %v612_v58 }
  0xf5   :  { %v643_v61 = vmul.f32 %v636_v51, %v636_v51 }
  0xf7   :  { %v648_v62 = vadd.f32 %v647_v60, %v643_v61 }
  0xf9   :  { %v649_v63 = vadd.f32 1e-12, %v648_v62  ;;  %v661_v3 = vadd.f32 1.0, %v648_v62 }
  0xfb   :  { %998 = vrsqrt.f32 %v649_v63  ;;  %vm656_vm2 = vweird.f32 %v649_v63 }
  0xfc   :  { %1000 = vrcp.f32 %v661_v3 }
 0x101   :  { %v999_v0 = vpop.eup %998 }
 0x102   :  { %v651_v1 = vmul.f32 %v999_v0, %v649_v63  ;;  %vm657_vm1 = vweird.f32 %v999_v0  ;;  %v1001_v9 = vpop.eup %1000 }
 0x103   :  { %vm658_vm3 = vmor %vm656_vm2, %vm657_vm1 }
 0x104   :  { %v652_v2 = vmul.f32 %v999_v0, %v651_v1 }
 0x106   :  { %v653_v4 = vmul.f32 0.5, %v652_v2 }
 0x108   :  { %v654_v5 = vsub.f32 1.5, %v653_v4 }
 0x10a   :  { %v655_v6 = vmul.f32 %v999_v0, %v654_v5 }
 0x10c   :  { %v659_v7 = vsel %vm658_vm3, %v999_v0, %v655_v6 }
 0x10d   :  { %v660_v8 = vmul.f32 %v659_v7, %v648_v62 }
 0x10f   :  { %v663_v10 = vmul.f32 %v1001_v9, %v660_v8 }
 0x111   :  { %v664_v11 = vmul.f32 %v663_v10, %v624_v39  ;;  %v665_v12 = vmul.f32 %v663_v10, %v626_v34  ;;  %v666_v13 = vmul.f32 %v663_v10, %v629_v40  ;;  %v667_v14 = vmul.f32 %v663_v10, %v631_v44 }
 0x112   :  { %v668_v15 = vmul.f32 %v663_v10, %v634_v52  ;;  %v669_v16 = vmul.f32 %v663_v10, %v636_v51 }
 0x113   :  { %670 = vst [vmem:[%s1296_s3] sm:$0xff] %v664_v11 }
 0x114   :  { %671 = vst [vmem:[%s1296_s3 + $0x8] sm:$0xff] %v665_v12 }
 0x115   :  { %672 = vst [vmem:[%s1296_s3 + $0x10] sm:$0xff] %v666_v13 }
 0x116   :  { %673 = vst [vmem:[%s1296_s3 + $0x18] sm:$0xff] %v667_v14 }
 0x117   :  { %674 = vst [vmem:[%s1296_s3 + $0x20] sm:$0xff] %v668_v15 }
 0x118   :  { %675 = vst [vmem:[%s1296_s3 + $0x28] sm:$0xff] %v669_v16 }

</bundles_post_ra>
